<compile_context>
chip_gen: v6e
topology: v6e:2x2x1
jax: 0.10.0
libtpu: 0.0.40
codegen_flags: <defaults>
</compile_context>

<pallas_src>
import functools
import math

import jax
import jax.numpy as jnp
from jax.experimental import pallas as pl
from jax.experimental.pallas import tpu as pltpu


def _round_up(x, m):
    return ((x + m - 1) // m) * m


def _log_softmax_rows(x):
    # numerically-stable log_softmax along the last axis
    m = jnp.max(x, axis=-1, keepdims=True)
    z = x - m
    lse = jnp.log(jnp.sum(jnp.exp(z), axis=-1, keepdims=True))
    return z - lse


# ----------------------------------------------------------------------------
# Kernel A: 'mean' / 'sum' reductions — scalar accumulator across the grid
# ----------------------------------------------------------------------------
def _ce_reduce_kernel(pred_ref, tgt_ref, out_ref, *, scale):
    @pl.when(pl.program_id(0) == 0)
    def _init():
        out_ref[...] = jnp.zeros_like(out_ref)

    x = pred_ref[...].astype(jnp.float32)            # (tile_n, C)
    t = tgt_ref[...].astype(jnp.float32)             # (tile_n, C)
    logp = _log_softmax_rows(x)
    partial = jnp.sum(-t * logp)                     # scalar partial sum
    out_ref[...] += jnp.reshape(partial, (1, 1))

    @pl.when(pl.program_id(0) == pl.num_programs(0) - 1)
    def _finalize():
        out_ref[...] = out_ref[...] * scale


# ----------------------------------------------------------------------------
# Kernel B: 'none' reduction — per-row cross entropy
# ----------------------------------------------------------------------------
def _ce_none_kernel(pred_ref, tgt_ref, out_ref):
    x = pred_ref[...].astype(jnp.float32)            # (tile_n, C)
    t = tgt_ref[...].astype(jnp.float32)
    logp = _log_softmax_rows(x)
    out_ref[...] = jnp.sum(-t * logp, axis=-1, keepdims=True)   # (tile_n, 1)


# ----------------------------------------------------------------------------
# Wrapper: matches SoftTargetCrossEntropyLoss.forward semantics
# ----------------------------------------------------------------------------
def soft_target_cross_entropy_loss(pred, target, reduction="mean", tile_n=128):
    if reduction not in ("mean", "sum", "none"):
        raise ValueError(
            "{} is not a valid value for reduction".format(reduction))
    if pred.shape != target.shape:
        raise ValueError("pred and target must have the same shape")

    lead_shape = pred.shape[:-1]
    C = pred.shape[-1]
    N = int(math.prod(lead_shape)) if lead_shape else 1

    pred2d = jnp.reshape(pred, (N, C))
    tgt2d = jnp.reshape(target, (N, C))

    # row-tile size: multiple of 8 sublanes, no larger than the (padded) row count
    tile_n = _round_up(max(8, min(tile_n, N)), 8)
    n_pad = _round_up(N, tile_n)
    if n_pad != N:
        pad = ((0, n_pad - N), (0, 0))
        # zero-padded targets => padded rows contribute exactly 0 to the loss
        pred2d = jnp.pad(pred2d, pad)
        tgt2d = jnp.pad(tgt2d, pad)

    grid = (n_pad // tile_n,)
    in_specs = [pl.BlockSpec((tile_n, C), lambda i: (i, 0)),
                pl.BlockSpec((tile_n, C), lambda i: (i, 0))]

    cost = pl.CostEstimate(flops=6 * n_pad * C,
                           transcendentals=n_pad * (C + 1),
                           bytes_accessed=2 * n_pad * C * 4 + 8)

    if reduction in ("mean", "sum"):
        scale = (1.0 / float(N)) if reduction == "mean" else 1.0
        out = pl.pallas_call(
            functools.partial(_ce_reduce_kernel, scale=scale),
            out_shape=jax.ShapeDtypeStruct((1, 1), jnp.float32),
            grid=grid,
            in_specs=in_specs,
            out_specs=pl.BlockSpec((1, 1), lambda i: (0, 0)),
            compiler_params=pltpu.CompilerParams(
                dimension_semantics=("arbitrary",)),
            cost_estimate=cost,
        )(pred2d, tgt2d)
        return out[0, 0]

    # reduction == "none"
    out = pl.pallas_call(
        _ce_none_kernel,
        out_shape=jax.ShapeDtypeStruct((n_pad, 1), jnp.float32),
        grid=grid,
        in_specs=in_specs,
        out_specs=pl.BlockSpec((tile_n, 1), lambda i: (i, 0)),
        compiler_params=pltpu.CompilerParams(
            dimension_semantics=("parallel",)),
        cost_estimate=cost,
    )(pred2d, tgt2d)
    ce = out[:N, 0]
    return jnp.reshape(ce, lead_shape)


# ----------------------------------------------------------------------------
if __name__ == "__main__":
    key = jax.random.PRNGKey(0)
    k_pred, k_tgt = jax.random.split(key)

    # small, module-consistent shapes: (batch, seq, classes) with lane-dense C
    B, S, C = 4, 64, 128
    pred = jax.random.normal(k_pred, (B, S, C), jnp.float32)
    target = jax.nn.softmax(
        jax.random.normal(k_tgt, (B, S, C), jnp.float32), axis=-1)

    # default reduction ('mean'): 256 rows -> grid of 2 row tiles
    loss = soft_target_cross_entropy_loss(pred, target, reduction="mean")
    loss = jax.block_until_ready(loss)

    ref_rows = jnp.sum(-target * jax.nn.log_softmax(pred, axis=-1), axis=-1)
    ref_mean = jnp.mean(ref_rows)
    assert loss.shape == ()
    assert bool(jnp.isfinite(loss))
    assert bool(jnp.allclose(loss, ref_mean, rtol=1e-5, atol=1e-5))

    # 'sum' reduction
    loss_sum = jax.block_until_ready(
        soft_target_cross_entropy_loss(pred, target, reduction="sum"))
    assert bool(jnp.allclose(loss_sum, jnp.sum(ref_rows), rtol=1e-5, atol=1e-4))

    # 'none' reduction
    loss_none = jax.block_until_ready(
        soft_target_cross_entropy_loss(pred, target, reduction="none"))
    assert loss_none.shape == ref_rows.shape
    assert bool(jnp.allclose(loss_none, ref_rows, rtol=1e-5, atol=1e-5))

    print("KERNEL_OK")
</pallas_src>

<mosaic_0001>
module attributes {stable_mosaic.version = 11 : i64} {
  func.func @_ce_reduce_kernel(%arg0: i32, %arg1: memref<128x128xf32, #tpu.memory_space<vmem>>, %arg2: memref<128x128xf32, #tpu.memory_space<vmem>>, %arg3: memref<1x1xf32, #tpu.memory_space<vmem>>) attributes {dimension_semantics = [#tpu.dimension_semantics<arbitrary>], iteration_bounds = array<i64: 2>, scalar_prefetch = 0 : i64, scratch_operands = 0 : i64, tpu.core_type = #tpu.core_type<tc>, window_params = [{transform_indices = @transform_0, window_bounds = array<i64: 128, 128>}, {transform_indices = @transform_1, window_bounds = array<i64: 128, 128>}, {pipeline_mode = #tpu.pipeline_mode<synchronous>, transform_indices = @transform_2, window_bounds = array<i64: 1, 1>}]} {
    %c0_i32 = arith.constant 0 : i32
    %0 = arith.cmpi eq, %arg0, %c0_i32 : i32
    %1 = arith.extui %0 : i1 to i32
    %c0_i32_0 = arith.constant 0 : i32
    %2 = arith.cmpi ne, %1, %c0_i32_0 : i32
    scf.if %2 {
      %cst_12 = arith.constant 0.000000e+00 : f32
      %29 = vector.broadcast %cst_12 : f32 to vector<1x1xf32>
      %c0_13 = arith.constant 0 : index
      %c0_14 = arith.constant 0 : index
      %30 = vector.load %arg3[%c0_13, %c0_14] : memref<1x1xf32, #tpu.memory_space<vmem>>, vector<1x1xf32>
      tpu.vector_store %arg3[%c0_13, %c0_14], %29 {strides = array<i32>} : memref<1x1xf32, #tpu.memory_space<vmem>>, vector<1x1xf32>,
    } else {
    }
    %c0 = arith.constant 0 : index
    %c0_1 = arith.constant 0 : index
    %3 = vector.load %arg1[%c0, %c0_1] : memref<128x128xf32, #tpu.memory_space<vmem>>, vector<128x128xf32>
    %c0_2 = arith.constant 0 : index
    %c0_3 = arith.constant 0 : index
    %4 = vector.load %arg2[%c0_2, %c0_3] : memref<128x128xf32, #tpu.memory_space<vmem>>, vector<128x128xf32>
    %cst = arith.constant dense<0xFF800000> : vector<128xf32>
    %5 = vector.multi_reduction <maximumf>, %3, %cst [1] : vector<128x128xf32> to vector<128xf32>
    %6 = vector.shape_cast %5 : vector<128xf32> to vector<128x1xf32>
    %7 = vector.broadcast %6 : vector<128x1xf32> to vector<128x128xf32>
    %8 = arith.subf %3, %7 : vector<128x128xf32>
    %9 = math.exp %8 : vector<128x128xf32>
    %cst_4 = arith.constant dense<0.000000e+00> : vector<128xf32>
    %10 = vector.multi_reduction <add>, %9, %cst_4 [1] : vector<128x128xf32> to vector<128xf32>
    %11 = vector.shape_cast %10 : vector<128xf32> to vector<128x1xf32>
    %12 = math.log %11 : vector<128x1xf32>
    %13 = vector.broadcast %12 : vector<128x1xf32> to vector<128x128xf32>
    %14 = arith.subf %8, %13 : vector<128x128xf32>
    %cst_5 = arith.constant 0.000000e+00 : f32
    %15 = vector.broadcast %cst_5 : f32 to vector<128x128xf32>
    %16 = arith.subf %15, %4 : vector<128x128xf32>
    %17 = arith.mulf %16, %14 : vector<128x128xf32>
    %18 = vector.shape_cast %17 : vector<128x128xf32> to vector<1x128x128xf32>
    %cst_6 = arith.constant dense<0.000000e+00> : vector<1xf32>
    %19 = vector.multi_reduction <add>, %18, %cst_6 [1, 2] : vector<1x128x128xf32> to vector<1xf32>
    %20 = vector.shape_cast %19 : vector<1xf32> to vector<1x1x1xf32>
    %21 = vector.extract %20[0, 0, 0] : f32 from vector<1x1x1xf32>
    %c0_7 = arith.constant 0 : index
    %c0_8 = arith.constant 0 : index
    %22 = vector.load %arg3[%c0_7, %c0_8] : memref<1x1xf32, #tpu.memory_space<vmem>>, vector<1x1xf32>
    %23 = vector.broadcast %21 : f32 to vector<1x1xf32>
    %24 = arith.addf %22, %23 : vector<1x1xf32>
    %c0_9 = arith.constant 0 : index
    %c0_10 = arith.constant 0 : index
    %25 = vector.load %arg3[%c0_9, %c0_10] : memref<1x1xf32, #tpu.memory_space<vmem>>, vector<1x1xf32>
    tpu.vector_store %arg3[%c0_9, %c0_10], %24 {strides = array<i32>} : memref<1x1xf32, #tpu.memory_space<vmem>>, vector<1x1xf32>,
    %c1_i32 = arith.constant 1 : i32
    %26 = arith.cmpi eq, %arg0, %c1_i32 : i32
    %27 = arith.extui %26 : i1 to i32
    %c0_i32_11 = arith.constant 0 : i32
    %28 = arith.cmpi ne, %27, %c0_i32_11 : i32
    scf.if %28 {
      %c0_12 = arith.constant 0 : index
      %c0_13 = arith.constant 0 : index
      %29 = vector.load %arg3[%c0_12, %c0_13] : memref<1x1xf32, #tpu.memory_space<vmem>>, vector<1x1xf32>
      %cst_14 = arith.constant 3.906250e-03 : f32
      %30 = vector.broadcast %cst_14 : f32 to vector<1x1xf32>
      %31 = arith.mulf %29, %30 : vector<1x1xf32>
      %c0_15 = arith.constant 0 : index
      %c0_16 = arith.constant 0 : index
      %32 = vector.load %arg3[%c0_15, %c0_16] : memref<1x1xf32, #tpu.memory_space<vmem>>, vector<1x1xf32>
      tpu.vector_store %arg3[%c0_15, %c0_16], %31 {strides = array<i32>} : memref<1x1xf32, #tpu.memory_space<vmem>>, vector<1x1xf32>,
    } else {
    }
    return
  }
  func.func @transform_0(%arg0: i32) -> (i32, i32) {
    %c0_i32 = arith.constant 0 : i32
    %c0_i32_0 = arith.constant 0 : i32
    return %arg0, %c0_i32 : i32, i32
  }
  func.func @transform_1(%arg0: i32) -> (i32, i32) {
    %c0_i32 = arith.constant 0 : i32
    %c0_i32_0 = arith.constant 0 : i32
    return %arg0, %c0_i32 : i32, i32
  }
  func.func @transform_2(%arg0: i32) -> (i32, i32) {
    %c0_i32 = arith.constant 0 : i32
    %c0_i32_0 = arith.constant 0 : i32
    %c0_i32_1 = arith.constant 0 : i32
    return %c0_i32, %c0_i32_0 : i32, i32
  }
}

</mosaic_0001>

<bundles_post_ra>
// kernel: tpu_custom_call.1
= control target key start
LH: loop header
LB: loop body
LE: loop exit
PB: predicated region body
PF: predicated region fallthrough
CT: control target
= control target key end

     0   :  { %7 = vsyncpa [#allocation3], 0  ;;  %s1112_s0 = inlined_call_operand.hbm [shape: f32[256,128], index: 0, kind: input, shape index: {}]   ;;  %s1113_s1 = inlined_call_operand.hbm [shape: f32[256,128], index: 1, kind: input, shape index: {}]   ;;  %s1114_s2 = inlined_call_operand.hbm [shape: f32[1,1], index: 2, kind: output, shape index: {}]  }
   0x1   :  { %9 = vsyncpa [#allocation3 + $0x1], 0 }
   0x2   :  { %10 = vsyncpa [#allocation6], 0 }
   0x3   :  { %12 = vsyncpa [#allocation6 + $0x1], 0 }
   0x4   :  { %13 = vsyncpa [#allocation4], 0  ;;  %s823_s9 = smov 0   ;;  %s825_s10 = smov 0  }
   0x5   :  { %s827_s11 = smov 0   ;;  %s829_s12 = smov 0  }
   0x6 LB: > { %s842_s13 = sadd.s32 4294967295, %s800_s12   ;;  %s845_s14 = sadd.s32 1, %s800_s12   ;;  %s800_s12 = sphi %s829_s12, %s1124_s12   ;;  %s796_s11 = sphi %s827_s11, %s1123_s11   ;;  %s792_s10 = sphi %s825_s10, %s1122_s10   ;;  %s788_s9 = sphi %s823_s9, %s1121_s9  }
   0x7   : > { %s23_s15 = ssub.s32 %s800_s12, %s845_s14  ;;  %s26_s16 = sadd.s32 1, %s796_s11 }
   0x8   : > { %p24_p0 = scmp.eq.s32.totalorder %s23_s15, 0  ;;  %p33_p1 = scmp.ne.s32.totalorder %s796_s11, %s792_s10 }
   0x9   : > { %p34_p2 = scmp.eq.s32.totalorder %s800_s12, 0  ;;  %p39_p3 = scmp.ne.s32.totalorder %s792_s10, %s788_s9 }
   0xa   : > { %s855_s17 = scalar_select %p24_p0, %s796_s11, %s26_s16  }
   0xb   : > { %p35_p4 = por %p34_p2, %p33_p1  ;;  %p40_p5 = scmp.eq.s32.totalorder %s842_s13, 0 }
   0xc   : > { %p575_p6 = scmp.lt.s32.totalorder %s800_s12, 2  ;;  %s864_s19 = sand.u32 1, %s796_s11  }
   0xd   : > { %p859_p7 = por %p40_p5, %p39_p3  ;;  %s541_s20 = sshll.u32 %s864_s19, 7 }
   0xe   : > { %s556_s21 = sshll.u32 %s800_s12, 11  ;;  %s114_s25 = scalar_lea.vmem [#allocation2], %s541_s20 }
   0xf   : > { %s1116_s18 = scalar_select %p859_p7, 1, 0 }
  0x10   : > { %s873_s24 = scalar_lea.hbm %s1112_s0, %s556_s21  ;;  %s121_s26 = sshll.u32 %s114_s25, 4  ;;  %s877_s26 = int_to_ptr.vmem [resolvable:$true] %s121_s26 }
  0x11   : > { %p879_p8 = pnand %p575_p6, %p35_p4  ;;  %s111_s28 = scalar_lea.sflag [#allocation3], %s864_s19 }
  0x12   : > { %s678_s29 = scalar_lea.hbm %s873_s24, 2048  ;;  %s683_s4 = scalar_lea.hbm %s1112_s0, 4096 }
  0x13   : > { %p679_p10 = scmp.ne.s32.totalorder %s873_s24, %s678_s29  ;;  %p680_p11 = pneg %p879_p8 }
  0x14   : > { %p684_p0 = scmp.lt.s32.totalorder %s873_s24, %s1112_s0  ;;  %p685_p1 = scmp.lt.s32.totalorder %s683_s4, %s678_s29 }
  0x15   : > { %p681_p12 = pnand %p680_p11, %p679_p10 }
  0x16   : > { %p686_p2 = por %p685_p1, %p684_p0 }
  0x17   : > { %p682_p13 = pneg %p681_p12 }
  0x19   : > { %p687_p3 = pnand %p686_p2, %p682_p13 }
  0x1b   : > { %690 = shalt.err (!%p687_p3)
}
  0x1c   : > { %s691_s7 = scalar_lea.vmem %s877_s26, 2048  ;;  %s802_s8 = smov [#allocation2]  }
  0x1d   : > { %p692_p4 = scmp.ne.s32.totalorder %s877_s26, %s691_s7  ;;  %s696_s9 = sshll.u32 %s802_s8, 4  ;;  %s697_s9 = int_to_ptr.vmem [resolvable:$false] %s696_s9 }
  0x1e   : > { %s698_s15 = scalar_lea.vmem %s697_s9, 4096  ;;  %p699_p10 = scmp.lt.s32.totalorder %s877_s26, %s697_s9 }
  0x1f   : > { %p694_p5 = pnand %p692_p4, %p680_p11  ;;  %p700_p12 = scmp.lt.s32.totalorder %s698_s15, %s691_s7 }
  0x21   : > { %p695_p6 = pneg %p694_p5  ;;  %p701_p9 = por %p700_p12, %p699_p10 }
  0x23   : > { %p702_p0 = pnand %p701_p9, %p695_p6 }
  0x25   : > { %705 = shalt.err (!%p702_p0)
}
  0x26   : > { %s803_s16 = smov 128   ;;  %s804_s22 = smov 8  }
  0x27   : > { %571 = dma.hbm_to_vmem [thread:$0]  (!%p879_p8), %s873_s24, 2048, %s877_s26, %s111_s28, %s803_s16, %s803_s16, %s804_s22  }
  0x28   : > { %p150_p9 = scmp.lt.s32.totalorder %s800_s12, 3  ;;  %s920_s29 = scalar_lea.hbm %s1113_s1, %s556_s21 }
  0x29   : > { %p1118_p13 = scmp.ge.s32.totalorder %s800_s12, 1  ;;  %s135_s3 = scalar_lea.vmem [#allocation5], %s541_s20 }
  0x2a   : > { %s142_s4 = sshll.u32 %s135_s3, 4  ;;  %s132_s24 = scalar_lea.sflag [#allocation6], %s864_s19  ;;  %s930_s4 = int_to_ptr.vmem [resolvable:$true] %s142_s4 }
  0x2b   : > { %p924_p1 = pnand %p1118_p13, %p150_p9  ;;  %s706_s26 = scalar_lea.hbm %s920_s29, 2048 }
  0x2c   : > { %p707_p2 = scmp.ne.s32.totalorder %s920_s29, %s706_s26  ;;  %s711_s28 = scalar_lea.hbm %s1113_s1, 4096 }
  0x2d   : > { %p712_p5 = scmp.lt.s32.totalorder %s920_s29, %s1113_s1  ;;  %p713_p6 = scmp.lt.s32.totalorder %s711_s28, %s706_s26 }
  0x2e   : > { %p709_p3 = pnand %p707_p2, %p680_p11 }
  0x2f   : > { %p714_p10 = por %p713_p6, %p712_p5 }
  0x30   : > { %p710_p4 = pneg %p709_p3 }
  0x32   : > { %p715_p12 = pnand %p714_p10, %p710_p4 }
  0x34   : > { %718 = shalt.err (!%p715_p12)
}
  0x35   : > { %s719_s19 = scalar_lea.vmem %s930_s4, 2048  ;;  %s805_s20 = smov [#allocation5]  }
  0x36   : > { %p720_p0 = scmp.ne.s32.totalorder %s930_s4, %s719_s19  ;;  %s724_s7 = sshll.u32 %s805_s20, 4  ;;  %s725_s7 = int_to_ptr.vmem [resolvable:$false] %s724_s7 }
  0x37   : > { %s726_s8 = scalar_lea.vmem %s725_s7, 4096  ;;  %p727_p2 = scmp.lt.s32.totalorder %s930_s4, %s725_s7 }
  0x38   : > { %p722_p9 = pnand %p720_p0, %p680_p11  ;;  %p728_p3 = scmp.lt.s32.totalorder %s726_s8, %s719_s19 }
  0x3a   : > { %p723_p13 = pneg %p722_p9  ;;  %p729_p7 = por %p728_p3, %p727_p2 }
  0x3c   : > { %p730_p5 = pnand %p729_p7, %p723_p13 }
  0x3e   : > { %733 = shalt.err (!%p730_p5)
}
  0x3f   : > { %574 = dma.hbm_to_vmem [thread:$0]  (!%p879_p8), %s920_s29, 2048, %s930_s4, %s132_s24, %s803_s16, %s803_s16, %s804_s22  }
  0x40   : > { %154 = sbr.rel (%p924_p1) target bundleno = 659 (0x293), region = 28  ;;  %s156_s9 = sand.u32 (!%p924_p1), 1, %s792_s10  }
  0x41   : > { %s548_s15 = sshll.u32 (!%p924_p1), %s156_s9, 7  ;;  %s157_s23 = scalar_lea.sflag (!%p924_p1), [#allocation3], %s156_s9 }
  0x42   : > { %s961_s25 = scalar_lea.vmem (!%p924_p1), [#allocation2], %s548_s15  ;;  %p1120_p7 = scmp.ne.s32.totalorder (!%p924_p1), %s1116_s18, 0 }
  0x45   : > { %775 = dma.done.wait (%p1120_p7), %s157_s23, 2048  }
  0x46   : > { %777 = vsyncadd (%p1120_p7), %s157_s23, 4294965248  ;;  %s166_s27 = scalar_lea.sflag [#allocation6], %s156_s9  ;;  %s967_s3 = scalar_lea.vmem [#allocation5], %s548_s15 }
  0x47   : > { %779 = dma.done.wait (%p1120_p7), %s166_s27, 2048  }
  0x48   : > { %781 = vsyncadd (%p1120_p7), %s166_s27, 4294965248  ;;  %p550_p8 = scmp.ne.s32.totalorder %s842_s13, 0 }
  0x4a   : > { %195 = sbr.rel (%p550_p8) target bundleno = 81 (0x51), region = 40 }
  0x4f   : > { %vm196_vm0 = vcmask 0   ;;  %v806_v0 = vmov 0.0  }
  0x50   : > { %197 = vst.msk [vmem:[#allocation7] sm:$0x1] %vm196_vm0, %v806_v0 }
  0x51 PF: > { %v198_v1 = vld [vmem:[%s961_s25] sm:$0xff]  ;;  %v200_v2 = vld [vmem:[%s961_s25 + $0x10] sm:$0xff]  ;;  %v199_v3 = vld [vmem:[%s961_s25 + $0x8] sm:$0xff]  ;;  %vm449_vm1 = vcmask 0   ;;  %p551_p11 = scmp.ne.s32.totalorder %s842_s13, 1 }
  0x52   : > { %230 = vmax.xlane.f32.xlu0 %v198_v1  ;;  %234 = vmax.xlane.f32.xlu1 %v200_v2  ;;  %v201_v4 = vld [vmem:[%s961_s25 + $0x18] sm:$0xff]  ;;  %v202_v5 = vld [vmem:[%s961_s25 + $0x20] sm:$0xff]  ;;  %v203_v6 = vld [vmem:[%s961_s25 + $0x28] sm:$0xff] }
  0x53   : > { %v204_v7 = vld [vmem:[%s961_s25 + $0x30] sm:$0xff]  ;;  %v205_v8 = vld [vmem:[%s961_s25 + $0x38] sm:$0xff]  ;;  %v206_v9 = vld [vmem:[%s961_s25 + $0x40] sm:$0xff] }
  0x54   : > { %v207_v10 = vld [vmem:[%s961_s25 + $0x48] sm:$0xff]  ;;  %v208_v11 = vld [vmem:[%s961_s25 + $0x50] sm:$0xff]  ;;  %v209_v12 = vld [vmem:[%s961_s25 + $0x58] sm:$0xff] }
  0x55   : > { %v987_v13 = vld [vmem:[%s961_s25 + $0x60] sm:$0xff]  ;;  %v990_v14 = vld [vmem:[%s961_s25 + $0x68] sm:$0xff]  ;;  %v995_v15 = vld [vmem:[%s961_s25 + $0x70] sm:$0xff] }
  0x56   : > { %232 = vmax.xlane.f32.xlu0 %v199_v3  ;;  %236 = vmax.xlane.f32.xlu1 %v201_v4  ;;  %v998_v16 = vld [vmem:[%s961_s25 + $0x78] sm:$0xff] }
  0x5a   : > { %238 = vmax.xlane.f32.xlu0 %v202_v5  ;;  %240 = vmax.xlane.f32.xlu1 %v203_v6 }
  0x5e   : > { %242 = vmax.xlane.f32.xlu0 %v204_v7  ;;  %244 = vmax.xlane.f32.xlu1 %v205_v8 }
  0x62   : > { %246 = vmax.xlane.f32.xlu0 %v206_v9  ;;  %248 = vmax.xlane.f32.xlu1 %v207_v10 }
  0x66   : > { %250 = vmax.xlane.f32.xlu0 %v208_v11  ;;  %252 = vmax.xlane.f32.xlu1 %v209_v12 }
  0x6a   : > { %254 = vmax.xlane.f32.xlu0 %v987_v13  ;;  %256 = vmax.xlane.f32.xlu1 %v990_v14 }
  0x6e   : > { %258 = vmax.xlane.f32.xlu0 %v995_v15  ;;  %260 = vmax.xlane.f32.xlu1 %v998_v16 }
  0xdb   : > { %v231_v17 = vpop.xlane.xlu0 %230  ;;  %v235_v18 = vpop.xlane.xlu1 %234 }
  0xdc   : > { %v1002_v19 = vsub.f32 %v198_v1, %v231_v17  ;;  %v1004_v20 = vsub.f32 %v200_v2, %v235_v18 }
  0xde   : > { %v278_v21 = vmul.f32 1.442695, %v1002_v19  ;;  %v282_v22 = vmul.f32 1.442695, %v1004_v20 }
  0xdf   : > { %v233_v23 = vpop.xlane.xlu0 %232  ;;  %v237_v24 = vpop.xlane.xlu1 %236 }
  0xe0   : > { %614 = vpow2.f32 %v278_v21  ;;  %v1008_v25 = vsub.f32 %v199_v3, %v233_v23  ;;  %v1010_v26 = vsub.f32 %v201_v4, %v237_v24 }
  0xe1   : > { %616 = vpow2.f32 %v282_v22 }
  0xe2   : > { %v280_v27 = vmul.f32 1.442695, %v1008_v25  ;;  %v284_v28 = vmul.f32 1.442695, %v1010_v26 }
  0xe3   : > { %v239_v29 = vpop.xlane.xlu0 %238  ;;  %v241_v30 = vpop.xlane.xlu1 %240 }
  0xe4   : > { %618 = vpow2.f32 %v280_v27  ;;  %v1014_v31 = vsub.f32 %v202_v5, %v239_v29  ;;  %v1016_v32 = vsub.f32 %v203_v6, %v241_v30  ;;  %v214_v30 = vld [vmem:[%s967_s3] sm:$0xff] }
  0xe5   : > { %620 = vpow2.f32 %v284_v28 }
  0xe6   : > { %v286_v33 = vmul.f32 1.442695, %v1014_v31  ;;  %v288_v34 = vmul.f32 1.442695, %v1016_v32 }
  0xe7   : > { %v243_v35 = vpop.xlane.xlu0 %242  ;;  %v245_v36 = vpop.xlane.xlu1 %244 }
  0xe8   : > { %622 = vpow2.f32 %v286_v33  ;;  %v1020_v37 = vsub.f32 %v204_v7, %v243_v35  ;;  %v1022_v38 = vsub.f32 %v205_v8, %v245_v36  ;;  %v215_v33 = vld [vmem:[%s967_s3 + $0x8] sm:$0xff] }
  0xe9   : > { %624 = vpow2.f32 %v288_v34 }
  0xea   : > { %v290_v39 = vmul.f32 1.442695, %v1020_v37  ;;  %v292_v40 = vmul.f32 1.442695, %v1022_v38 }
  0xeb   : > { %v247_v41 = vpop.xlane.xlu0 %246  ;;  %v249_v42 = vpop.xlane.xlu1 %248 }
  0xec   : > { %626 = vpow2.f32 %v290_v39  ;;  %v1026_v43 = vsub.f32 %v206_v9, %v247_v41  ;;  %v1028_v44 = vsub.f32 %v207_v10, %v249_v42  ;;  %v216_v39 = vld [vmem:[%s967_s3 + $0x10] sm:$0xff]  ;;  %v390_v41 = vsub.f32 0.0, %v214_v30 }
  0xed   : > { %v615_v45 = vpop.eup %614  ;;  %628 = vpow2.f32 %v292_v40 }
  0xee   : > { %v294_v46 = vmul.f32 1.442695, %v1026_v43  ;;  %310 = vadd.xlane.f32.xlu0 %v615_v45  ;;  %v296_v47 = vmul.f32 1.442695, %v1028_v44  ;;  %v617_v48 = vpop.eup %616  ;;  %v391_v45 = vsub.f32 0.0, %v215_v33 }
  0xef   : > { %v251_v49 = vpop.xlane.xlu0 %250  ;;  %v253_v50 = vpop.xlane.xlu1 %252 }
  0xf0   : > { %630 = vpow2.f32 %v294_v46  ;;  %v1032_v51 = vsub.f32 %v208_v11, %v251_v49  ;;  %v1034_v52 = vsub.f32 %v209_v12, %v253_v50 }
  0xf1   : > { %v619_v53 = vpop.eup %618  ;;  %632 = vpow2.f32 %v296_v47 }
  0xf2   : > { %v298_v54 = vmul.f32 1.442695, %v1032_v51  ;;  %314 = vadd.xlane.f32.xlu0 %v617_v48  ;;  %312 = vadd.xlane.f32.xlu1 %v619_v53  ;;  %v300_v55 = vmul.f32 1.442695, %v1034_v52  ;;  %v621_v56 = vpop.eup %620  ;;  %v217_v48 = vld [vmem:[%s967_s3 + $0x18] sm:$0xff] }
  0xf3   : > { %v255_v57 = vpop.xlane.xlu0 %254  ;;  %v257_v58 = vpop.xlane.xlu1 %256 }
  0xf4   : > { %634 = vpow2.f32 %v298_v54  ;;  %v1039_v59 = vsub.f32 %v987_v13, %v255_v57  ;;  %v1042_v60 = vsub.f32 %v990_v14, %v257_v58  ;;  %v392_v54 = vsub.f32 0.0, %v216_v39 }
  0xf5   : > { %v623_v61 = vpop.eup %622  ;;  %636 = vpow2.f32 %v300_v55  ;;  %v218_v55 = vld [vmem:[%s967_s3 + $0x20] sm:$0xff] }
  0xf6   : > { %v302_v62 = vmul.f32 1.442695, %v1039_v59  ;;  %316 = vadd.xlane.f32.xlu1 %v621_v56  ;;  %318 = vadd.xlane.f32.xlu0 %v623_v61  ;;  %v304_v63 = vmul.f32 1.442695, %v1042_v60  ;;  %v625_v0 = vpop.eup %624 }
  0xf7   : > { %v259_v1 = vpop.xlane.xlu0 %258  ;;  %v261_v2 = vpop.xlane.xlu1 %260 }
  0xf8   : > { %638 = vpow2.f32 %v302_v62  ;;  %v1047_v3 = vsub.f32 %v995_v15, %v259_v1  ;;  %v1050_v4 = vsub.f32 %v998_v16, %v261_v2  ;;  %v393_v62 = vsub.f32 0.0, %v217_v48  ;;  %v219_v2 = vld [vmem:[%s967_s3 + $0x28] sm:$0xff] }
  0xf9   : > { %v627_v5 = vpop.eup %626  ;;  %640 = vpow2.f32 %v304_v63 }
  0xfa   : > { %v306_v6 = vmul.f32 1.442695, %v1047_v3  ;;  %320 = vadd.xlane.f32.xlu1 %v625_v0  ;;  %322 = vadd.xlane.f32.xlu0 %v627_v5  ;;  %v308_v7 = vmul.f32 1.442695, %v1050_v4  ;;  %v629_v8 = vpop.eup %628  ;;  %v394_v0 = vsub.f32 0.0, %v218_v55 }
  0xfc   : > { %642 = vpow2.f32 %v306_v6 }
  0xfd   : > { %v631_v9 = vpop.eup %630  ;;  %644 = vpow2.f32 %v308_v7 }
  0xfe   : > { %324 = vadd.xlane.f32.xlu1 %v629_v8  ;;  %326 = vadd.xlane.f32.xlu0 %v631_v9  ;;  %v633_v10 = vpop.eup %632  ;;  %v220_v9 = vld [vmem:[%s967_s3 + $0x30] sm:$0xff] }
 0x101   : > { %v635_v11 = vpop.eup %634 }
 0x102   : > { %328 = vadd.xlane.f32.xlu1 %v633_v10  ;;  %330 = vadd.xlane.f32.xlu0 %v635_v11  ;;  %v637_v12 = vpop.eup %636 }
 0x105   : > { %v639_v13 = vpop.eup %638 }
 0x106   : > { %332 = vadd.xlane.f32.xlu1 %v637_v12  ;;  %334 = vadd.xlane.f32.xlu0 %v639_v13  ;;  %v641_v14 = vpop.eup %640 }
 0x109   : > { %v643_v15 = vpop.eup %642 }
 0x10a   : > { %336 = vadd.xlane.f32.xlu1 %v641_v14  ;;  %338 = vadd.xlane.f32.xlu0 %v643_v15  ;;  %v645_v16 = vpop.eup %644  ;;  %v395_v14 = vsub.f32 0.0, %v219_v2 }
 0x10e   : > { %340 = vadd.xlane.f32.xlu1 %v645_v16  ;;  %v396_v16 = vsub.f32 0.0, %v220_v9 }
 0x177   : > { %v311_v17 = vpop.xlane.xlu0 %310 }
 0x178   : > { %646 = vlog2.f32 %v311_v17 }
 0x17b   : > { %v313_v18 = vpop.xlane.xlu1 %312  ;;  %v315_v21 = vpop.xlane.xlu0 %314 }
 0x17c   : > { %648 = vlog2.f32 %v313_v18  ;;  %v221_v18 = vld [vmem:[%s967_s3 + $0x38] sm:$0xff] }
 0x17d   : > { %650 = vlog2.f32 %v315_v21 }
 0x17f   : > { %v317_v22 = vpop.xlane.xlu1 %316  ;;  %v319_v23 = vpop.xlane.xlu0 %318 }
 0x180   : > { %652 = vlog2.f32 %v317_v22 }
 0x181   : > { %654 = vlog2.f32 %v319_v23 }
 0x183   : > { %v321_v24 = vpop.xlane.xlu1 %320  ;;  %v323_v27 = vpop.xlane.xlu0 %322 }
 0x184   : > { %656 = vlog2.f32 %v321_v24 }
 0x185   : > { %v647_v28 = vpop.eup %646  ;;  %658 = vlog2.f32 %v323_v27  ;;  %v222_v27 = vld [vmem:[%s967_s3 + $0x40] sm:$0xff] }
 0x186   : > { %v343_v29 = vmul.f32 0.6931472, %v647_v28 }
 0x187   : > { %v325_v34 = vpop.xlane.xlu1 %324  ;;  %v327_v35 = vpop.xlane.xlu0 %326 }
 0x188   : > { %660 = vlog2.f32 %v325_v34  ;;  %v374_v42 = vsub.f32 %v1002_v19, %v343_v29  ;;  %v397_v34 = vsub.f32 0.0, %v221_v18 }
 0x189   : > { %v649_v36 = vpop.eup %648  ;;  %662 = vlog2.f32 %v327_v35 }
 0x18a   : > { %v651_v40 = vpop.eup %650  ;;  %v345_v46 = vmul.f32 0.6931472, %v649_v36  ;;  %v406_v61 = vmul.f32 %v390_v41, %v374_v42  ;;  %v398_v36 = vsub.f32 0.0, %v222_v27 }
 0x18b   : > { %v347_v47 = vmul.f32 0.6931472, %v651_v40  ;;  %v329_v49 = vpop.xlane.xlu1 %328  ;;  %v331_v50 = vpop.xlane.xlu0 %330  ;;  %v223_v40 = vld [vmem:[%s967_s3 + $0x48] sm:$0xff] }
 0x18c   : > { %v375_v53 = vsub.f32 %v1008_v25, %v345_v46  ;;  %664 = vlog2.f32 %v329_v49 }
 0x18d   : > { %v653_v56 = vpop.eup %652  ;;  %v376_v57 = vsub.f32 %v1004_v20, %v347_v47  ;;  %666 = vlog2.f32 %v331_v50  ;;  %v224_v47 = vld [vmem:[%s967_s3 + $0x50] sm:$0xff] }
 0x18e   : > { %v655_v58 = vpop.eup %654  ;;  %v407_v19 = vmul.f32 %v391_v45, %v375_v53  ;;  %v349_v63 = vmul.f32 0.6931472, %v653_v56  ;;  %v399_v53 = vsub.f32 0.0, %v223_v40  ;;  %v225_v56 = vld [vmem:[%s967_s3 + $0x58] sm:$0xff] }
 0x18f   : > { %v351_v1 = vmul.f32 0.6931472, %v655_v58  ;;  %v333_v5 = vpop.xlane.xlu1 %332  ;;  %v335_v6 = vpop.xlane.xlu0 %334  ;;  %v408_v7 = vmul.f32 %v392_v54, %v376_v57  ;;  %v401_v2 = vsub.f32 0.0, %v225_v56 }
 0x190   : > { %v422_v25 = vadd.f32 %v407_v19, %v406_v61  ;;  %v377_v8 = vsub.f32 %v1010_v26, %v349_v63  ;;  %668 = vlog2.f32 %v333_v5  ;;  %v400_v19 = vsub.f32 0.0, %v224_v47  ;;  %v226_v63 = vld [vmem:[%s967_s3 + $0x60] sm:$0xff] }
 0x191   : > { %v657_v10 = vpop.eup %656  ;;  %v378_v20 = vsub.f32 %v1014_v31, %v351_v1  ;;  %670 = vlog2.f32 %v335_v6 }
 0x192   : > { %v659_v11 = vpop.eup %658  ;;  %v423_v12 = vadd.f32 %v422_v25, %v408_v7  ;;  %v409_v13 = vmul.f32 %v393_v62, %v377_v8  ;;  %v353_v15 = vmul.f32 0.6931472, %v657_v10  ;;  %v227_v25 = vld [vmem:[%s967_s3 + $0x68] sm:$0xff]  ;;  %v402_v10 = vsub.f32 0.0, %v226_v63 }
 0x193   : > { %v355_v17 = vmul.f32 0.6931472, %v659_v11  ;;  %v337_v21 = vpop.xlane.xlu1 %336  ;;  %v339_v22 = vpop.xlane.xlu0 %338  ;;  %v410_v26 = vmul.f32 %v394_v0, %v378_v20  ;;  %v228_v11 = vld [vmem:[%s967_s3 + $0x70] sm:$0xff] }
 0x194   : > { %v424_v23 = vadd.f32 %v423_v12, %v409_v13  ;;  %v379_v24 = vsub.f32 %v1016_v32, %v353_v15  ;;  %672 = vlog2.f32 %v337_v21  ;;  %v403_v15 = vsub.f32 0.0, %v227_v25 }
 0x195   : > { %v661_v28 = vpop.eup %660  ;;  %v380_v31 = vsub.f32 %v1020_v37, %v355_v17  ;;  %674 = vlog2.f32 %v339_v22  ;;  %v229_v17 = vld [vmem:[%s967_s3 + $0x78] sm:$0xff]  ;;  %v404_v22 = vsub.f32 0.0, %v228_v11 }
 0x196   : > { %v663_v29 = vpop.eup %662  ;;  %v425_v30 = vadd.f32 %v424_v23, %v410_v26  ;;  %v411_v33 = vmul.f32 %v395_v14, %v379_v24  ;;  %v357_v35 = vmul.f32 0.6931472, %v661_v28  ;;  %v405_v27 = vsub.f32 0.0, %v229_v17 }
 0x197   : > { %v359_v39 = vmul.f32 0.6931472, %v663_v29  ;;  %v341_v41 = vpop.xlane.xlu1 %340  ;;  %v412_v45 = vmul.f32 %v396_v16, %v380_v31 }
 0x198   : > { %v426_v42 = vadd.f32 %v425_v30, %v411_v33  ;;  %v381_v32 = vsub.f32 %v1022_v38, %v357_v35  ;;  %676 = vlog2.f32 %v341_v41 }
 0x199   : > { %v665_v46 = vpop.eup %664  ;;  %v382_v37 = vsub.f32 %v1026_v43, %v359_v39 }
 0x19a   : > { %v667_v48 = vpop.eup %666  ;;  %v427_v49 = vadd.f32 %v426_v42, %v412_v45  ;;  %v413_v50 = vmul.f32 %v397_v34, %v381_v32  ;;  %v361_v54 = vmul.f32 0.6931472, %v665_v46 }
 0x19b   : > { %v363_v55 = vmul.f32 0.6931472, %v667_v48  ;;  %v414_v58 = vmul.f32 %v398_v36, %v382_v37 }
 0x19c   : > { %v428_v57 = vadd.f32 %v427_v49, %v413_v50  ;;  %v383_v61 = vsub.f32 %v1028_v44, %v361_v54 }
 0x19d   : > { %v669_v38 = vpop.eup %668  ;;  %v384_v62 = vsub.f32 %v1032_v51, %v363_v55 }
 0x19e   : > { %v671_v43 = vpop.eup %670  ;;  %v429_v0 = vadd.f32 %v428_v57, %v414_v58  ;;  %v415_v1 = vmul.f32 %v399_v53, %v383_v61  ;;  %v365_v5 = vmul.f32 0.6931472, %v669_v38 }
 0x19f   : > { %v367_v6 = vmul.f32 0.6931472, %v671_v43  ;;  %v416_v8 = vmul.f32 %v400_v19, %v384_v62 }
 0x1a0   : > { %v430_v7 = vadd.f32 %v429_v0, %v415_v1  ;;  %v385_v9 = vsub.f32 %v1034_v52, %v365_v5 }
 0x1a1   : > { %v673_v44 = vpop.eup %672  ;;  %v386_v20 = vsub.f32 %v1039_v59, %v367_v6 }
 0x1a2   : > { %v675_v12 = vpop.eup %674  ;;  %v431_v51 = vadd.f32 %v430_v7, %v416_v8  ;;  %v417_v13 = vmul.f32 %v401_v2, %v385_v9  ;;  %v369_v14 = vmul.f32 0.6931472, %v673_v44 }
 0x1a3   : > { %v371_v16 = vmul.f32 0.6931472, %v675_v12  ;;  %v418_v18 = vmul.f32 %v402_v10, %v386_v20 }
 0x1a4   : > { %v387_v21 = vsub.f32 %v1042_v60, %v369_v14  ;;  %v432_v23 = vadd.f32 %v431_v51, %v417_v13 }
 0x1a5   : > { %v677_v26 = vpop.eup %676  ;;  %v388_v52 = vsub.f32 %v1047_v3, %v371_v16  ;;  %v446_v3 = vld [vmem:[#allocation7] sm:$0x1] }
 0x1a6   : > { %v373_v24 = vmul.f32 0.6931472, %v677_v26  ;;  %v419_v28 = vmul.f32 %v403_v15, %v387_v21  ;;  %v433_v59 = vadd.f32 %v432_v23, %v418_v18 }
 0x1a7   : > { %v420_v29 = vmul.f32 %v404_v22, %v388_v52 }
 0x1a8   : > { %v389_v31 = vsub.f32 %v1050_v4, %v373_v24  ;;  %v434_v30 = vadd.f32 %v433_v59, %v419_v28 }
 0x1aa   : > { %v421_v33 = vmul.f32 %v405_v27, %v389_v31  ;;  %v435_v34 = vadd.f32 %v434_v30, %v420_v29 }
 0x1ac   : > { %v436_v35 = vadd.f32 %v435_v34, %v421_v33 }
 0x1ae   : > { %437 = vadd.xlane.f32.xlu0 %v436_v35 }
 0x237   : > { %v438_v36 = vpop.xlane.xlu0 %437 }
 0x238   : > { %v439_v39 = vrot.slane %v438_v36, 4 }
 0x23a   : > { %v440_v60 = vadd.f32 %v439_v39, %v438_v36 }
 0x23c   : > { %v441_v40 = vrot.slane %v440_v60, 2 }
 0x23e   : > { %v442_v41 = vadd.f32 %v441_v40, %v440_v60 }
 0x240   : > { %v443_v42 = vrot.slane %v442_v41, 1 }
 0x242   : > { %v444_v45 = vadd.f32 %v443_v42, %v442_v41 }
 0x244   : > { %558 = vpush %v444_v45 }
 0x275   : > { %s559_s18 = spop %558  ;;  %454 = sbr.rel (%p551_p11) target bundleno = 644 (0x284), region = 44 }
 0x276   : > { %v447_v32 = vstv %s559_s18 }
 0x277   : > { %v448_v46 = vadd.f32 %v447_v32, %v446_v3 }
 0x279   : > { %450 = vst.msk [vmem:[#allocation7] sm:$0x1] %vm449_vm1, %v448_v46 }
 0x280   : > { %v455_v4 = vld [vmem:[#allocation7] sm:$0x1] }
 0x281   : > { %v456_v37 = vmul.f32 0.00390625, %v455_v4 }
 0x283   : > { %457 = vst.msk [vmem:[#allocation7] sm:$0x1] %vm449_vm1, %v456_v37 }
 0x284 PF: > { %p576_p1 = scmp.eq.s32.totalorder %s842_s13, 1  ;;  %s807_s16 = smov [#allocation7]  }
 0x285   : > { %s465_s22 = sshll.u32 %s807_s16, 4  ;;  %s466_s22 = int_to_ptr.vmem [resolvable:$true] %s465_s22 }
 0x286   : > { %s734_s29 = scalar_lea.vmem %s466_s22, 16  ;;  %s740_s30 = scalar_lea.vmem %s466_s22, 32 }
 0x287   : > { %p735_p4 = scmp.ne.s32.totalorder %s466_s22, %s734_s29  ;;  %p741_p12 = scmp.lt.s32.totalorder %s466_s22, %s466_s22 }
 0x288   : > { %p742_p0 = scmp.lt.s32.totalorder %s740_s30, %s734_s29 }
 0x289   : > { %p736_p6 = pnand %p735_p4, %p576_p1 }
 0x28a   : > { %p743_p9 = por %p742_p0, %p741_p12 }
 0x28b   : > { %p737_p10 = pneg %p736_p6 }
 0x28d   : > { %p744_p13 = pnand %p743_p9, %p737_p10 }
 0x28f   : > { %747 = shalt.err (!%p744_p13)
}
 0x290   : > { %565 = dma.vmem_to_hbm [thread:$0]  (%p576_p1), %s466_s22, 16, %s1114_s2, [#allocation4]  }
 0x291   : > { %783 = dma.done.wait (%p576_p1), [#allocation4], 16  }
 0x292   : > { %785 = vsyncadd (%p576_p1), [#allocation4], 4294967280 }
 0x293 PF: > { %p16_p2 = scmp.ge.s32.totalorder %s845_s14, 4   ;;  %s1121_s9 = smov %s792_s10 }
 0x294   : > { %s1122_s10 = smov %s796_s11  ;;  %s1123_s11 = smov %s855_s17 }
 0x295   : > { %s1124_s12 = smov %s845_s14  ;;  %18 = sbr.rel (!%p16_p2) target bundleno = 6 (0x6), region = 86 }
 0x29a   :  { %478 = vsyncpa [#allocation3], 1 }
 0x29b   :  { %480 = vsyncpa [#allocation3 + $0x1], 1 }
 0x29c   :  { %481 = vsyncpa [#allocation6], 1 }
 0x29d   :  { %483 = vsyncpa [#allocation6 + $0x1], 1 }
 0x29e   :  { %484 = vsyncpa [#allocation4], 1 }
 0x29f   :  { %486 = vsyncpa [#allocation4 + $0x1], 1 }

</bundles_post_ra>
